<compile_context>
chip_gen: v6e
topology: v6e:2x2x1
jax: 0.10.0
libtpu: 0.0.40
codegen_flags: <defaults>
</compile_context>

<pallas_src>
import functools

import jax
import jax.numpy as jnp
from jax.experimental import pallas as pl
from jax.experimental.pallas import tpu as pltpu


def _round_up(x, m):
    return ((x + m - 1) // m) * m


# ---------------------------------------------------------------------------
# Fused kernel.
#   grid axis 0: row tiles of the (BQ_padded, C1) logits (reduction axis).
#   out: lane-dense (1, 128) f32; lanes 0..3 = loss_ce, loss_action,
#        loss_giou, loss_bbox.
# ---------------------------------------------------------------------------
def _set_criterion_kernel(num_rows, eos_coef, inv_wtot, inv_num_boxes,
                          inv_num_matched,
                          logits_ref, mrow_ref, box_ref, out_ref, acc_ref):
    r = pl.program_id(0)
    tile_rows, c1 = logits_ref.shape

    @pl.when(r == 0)
    def _init():
        acc_ref[...] = jnp.zeros_like(acc_ref)

    # ----- no-object baseline over this row tile ---------------------------
    logits = logits_ref[...].astype(jnp.float32)             # (TILE_R, C1)
    m = jnp.max(logits, axis=-1, keepdims=True)
    lse = m + jnp.log(jnp.sum(jnp.exp(logits - m), axis=-1, keepdims=True))
    noobj = logits[:, c1 - 1:c1]                              # static last-lane slice
    row = (r * tile_rows
           + jax.lax.broadcasted_iota(jnp.int32, (tile_rows, 1), 0))
    valid = row < num_rows                                    # mask tail padding
    base = jnp.where(valid, lse - noobj, 0.0)
    acc_ref[...] += eos_coef * jnp.sum(base, keepdims=True)   # (1, 1)

    # ----- finalize: matched correction + action CE + boxes ----------------
    @pl.when(r == pl.num_programs(0) - 1)
    def _finalize():
        mr = mrow_ref[...].astype(jnp.float32)                # (N, C1+1+2A)
        n, dm = mr.shape
        a_dim = (dm - c1 - 1) // 2
        ml = mr[:, 0:c1]                                      # matched logits
        lab = mr[:, c1:c1 + 1].astype(jnp.int32)              # matched labels
        act = mr[:, c1 + 1:c1 + 1 + a_dim]                    # matched pred actions
        tact = mr[:, c1 + 1 + a_dim:c1 + 1 + 2 * a_dim]       # matched tgt actions

        # matched-row CE correction term (N rows only)
        mm = jnp.max(ml, axis=-1, keepdims=True)
        mlse = mm + jnp.log(jnp.sum(jnp.exp(ml - mm), axis=-1, keepdims=True))
        mnoobj = ml[:, c1 - 1:c1]
        cls_ids = jax.lax.broadcasted_iota(jnp.int32, (n, c1), 1)
        tgt_logit = jnp.sum(jnp.where(cls_ids == lab, ml, 0.0),
                            axis=-1, keepdims=True)
        corr = jnp.sum((1.0 - eos_coef) * mlse - tgt_logit + eos_coef * mnoobj,
                       keepdims=True)
        loss_ce = (acc_ref[...] + corr) * inv_wtot

        # action: soft-label cross-entropy, mean over matched rows
        am = jnp.max(act, axis=-1, keepdims=True)
        alse = am + jnp.log(jnp.sum(jnp.exp(act - am), axis=-1, keepdims=True))
        logp = act - alse
        ce = -jnp.sum(tact * logp, axis=-1, keepdims=True)
        loss_action = jnp.sum(ce, keepdims=True) * inv_num_matched

        # boxes: GIoU + normalized L1 (coords on sublanes, N on lanes)
        bs = box_ref[...].astype(jnp.float32)                 # (16, N)
        sx0, sy0, sx1, sy1 = bs[0:1], bs[1:2], bs[2:3], bs[3:4]
        tx0, ty0, tx1, ty1 = bs[4:5], bs[5:6], bs[6:7], bs[7:8]
        s_xyxy = bs[0:4]
        t_xyxy = bs[4:8]
        size = bs[8:12]
        area_s = (sx1 - sx0) * (sy1 - sy0)
        area_t = (tx1 - tx0) * (ty1 - ty0)
        iw = jnp.maximum(jnp.minimum(sx1, tx1) - jnp.maximum(sx0, tx0), 0.0)
        ih = jnp.maximum(jnp.minimum(sy1, ty1) - jnp.maximum(sy0, ty0), 0.0)
        inter = iw * ih
        union = area_s + area_t - inter
        iou = inter * pl.reciprocal(jnp.where(union > 0.0, union, 1.0))
        cw = jnp.maximum(sx1, tx1) - jnp.minimum(sx0, tx0)
        ch = jnp.maximum(sy1, ty1) - jnp.minimum(sy0, ty0)
        area_c = jnp.maximum(cw, 0.0) * jnp.maximum(ch, 0.0)
        giou = iou - (area_c - union) * pl.reciprocal(
            jnp.where(area_c > 0.0, area_c, 1.0))
        loss_giou = jnp.sum(1.0 - giou, keepdims=True) * inv_num_boxes
        inv_size = pl.reciprocal(size)
        loss_bbox = (jnp.sum(jnp.abs(s_xyxy - t_xyxy) * inv_size, keepdims=True)
                     * inv_num_boxes)

        # single lane-dense (1, 128) output slab
        lane = jax.lax.broadcasted_iota(jnp.int32, (1, 128), 1)
        out_ref[...] = (jnp.where(lane == 0, loss_ce, 0.0)
                        + jnp.where(lane == 1, loss_action, 0.0)
                        + jnp.where(lane == 2, loss_giou, 0.0)
                        + jnp.where(lane == 3, loss_bbox, 0.0))


def set_criterion_losses(logits2d, mrow_slab, box_slab, *, num_rows, eos_coef,
                         num_boxes, tile_rows=256):
    bq, c1 = logits2d.shape
    assert bq == num_rows
    assert tile_rows % 8 == 0
    n = int(mrow_slab.shape[0])
    dm = int(mrow_slab.shape[1])

    tile_r = min(int(tile_rows), _round_up(num_rows, 8))
    pad_rows = _round_up(num_rows, tile_r)
    if pad_rows != bq:
        logits2d = jnp.pad(logits2d, ((0, pad_rows - bq), (0, 0)))
    num_tiles = pad_rows // tile_r

    wtot = float(eos_coef) * (num_rows - n) + n
    kernel = functools.partial(
        _set_criterion_kernel, int(num_rows), float(eos_coef),
        1.0 / wtot, 1.0 / float(num_boxes), 1.0 / float(n))

    # VMEM stays in the MiB range (2 x tile_r x C1 x 4B + tiny slabs), well
    # inside v7x's 64 MiB physical / default-scoped budget; no vmem_limit bump.
    return pl.pallas_call(
        kernel,
        grid=(num_tiles,),
        out_shape=jax.ShapeDtypeStruct((1, 128), jnp.float32),
        in_specs=[
            pl.BlockSpec((tile_r, c1), lambda r: (r, 0)),      # row-tiled logits
            pl.BlockSpec((n, dm), lambda r: (0, 0)),           # matched-row slab
            pl.BlockSpec((16, n), lambda r: (0, 0)),           # box slab
        ],
        out_specs=pl.BlockSpec((1, 128), lambda r: (0, 0)),
        scratch_shapes=[pltpu.VMEM((1, 1), jnp.float32)],
        compiler_params=pltpu.CompilerParams(
            dimension_semantics=("arbitrary",)),
    )(logits2d, mrow_slab, box_slab)


# ---------------------------------------------------------------------------
# SetCriterion.forward glue (matching indices supplied; single host)
# ---------------------------------------------------------------------------
def set_criterion_forward(outputs, targets, indices, *, num_classes, eos_coef,
                          tile_rows=256):
    pred_logits = outputs['pred_logits']      # (B, Q, C+1)
    pred_boxes = outputs['pred_boxes']        # (B, Q, 4) absolute xyxy
    pred_actions = outputs['pred_actions']    # (B, Q, A)
    B, Q, C1 = pred_logits.shape
    A = pred_actions.shape[-1]
    assert C1 == num_classes + 1

    # _get_src_permutation_idx  -> flat (b*Q + q) match table
    batch_idx = jnp.concatenate(
        [jnp.full_like(src, i) for i, (src, _) in enumerate(indices)])
    src_idx = jnp.concatenate([src for src, _ in indices])
    match_flat = (batch_idx * Q + src_idx).astype(jnp.int32)            # (N,)
    N = int(match_flat.shape[0])

    target_classes_o = jnp.concatenate(
        [t['labels'][J] for t, (_, J) in zip(targets, indices)]).astype(jnp.float32)
    target_actions_o = jnp.concatenate(
        [t['action_labels'][J] for t, (_, J) in zip(targets, indices)],
        axis=0).astype(jnp.float32)

    # Matched-row gathers (tiny: N rows).  TODO(synk): fold into the kernel via
    # scalar-prefetched match_flat + manual row DMAs at production B*Q.
    logits2d = pred_logits.reshape(B * Q, C1)
    logits_matched = logits2d[match_flat].astype(jnp.float32)
    actions_matched = pred_actions.reshape(B * Q, A)[match_flat].astype(jnp.float32)
    src_boxes = pred_boxes.reshape(B * Q, 4)[match_flat].astype(jnp.float32)

    target_boxes = jnp.concatenate(
        [t['boxes_xyxy'][i] for t, (_, i) in zip(targets, indices)],
        axis=0).astype(jnp.float32)
    image_size = jnp.concatenate(
        [t['image_size_xyxy_tgt'] for t in targets], axis=0).astype(jnp.float32)

    # Consolidated small inputs (2 slabs instead of 7 tiny arrays).
    mrow_slab = jnp.concatenate(
        [logits_matched, target_classes_o.reshape(N, 1),
         actions_matched, target_actions_o], axis=1)          # (N, C1+1+2A)
    box_slab = jnp.concatenate(
        [src_boxes.T, target_boxes.T, image_size.T,
         jnp.zeros((4, N), jnp.float32)], axis=0)              # (16, N)

    # num_boxes (single host: world_size = 1) — static shapes here.
    num_boxes = max(float(sum(int(t['labels'].shape[0]) for t in targets)), 1.0)

    out = set_criterion_losses(logits2d, mrow_slab, box_slab,
                               num_rows=B * Q, eos_coef=eos_coef,
                               num_boxes=num_boxes, tile_rows=tile_rows)
    return {
        'loss_ce': out[0, 0],
        'loss_action': out[0, 1],
        'loss_giou': out[0, 2],
        'loss_bbox': out[0, 3],
    }


# ---------------------------------------------------------------------------
# Pure-JAX reference (for correctness check)
# ---------------------------------------------------------------------------
def _reference_losses(outputs, targets, indices, *, num_classes, eos_coef):
    pred_logits = outputs['pred_logits']
    pred_boxes = outputs['pred_boxes']
    pred_actions = outputs['pred_actions']
    B, Q, C1 = pred_logits.shape

    batch_idx = jnp.concatenate(
        [jnp.full_like(src, i) for i, (src, _) in enumerate(indices)])
    src_idx = jnp.concatenate([src for src, _ in indices])

    tco = jnp.concatenate([t['labels'][J] for t, (_, J) in zip(targets, indices)])
    target_classes = jnp.full((B, Q), num_classes, jnp.int32)
    target_classes = target_classes.at[batch_idx, src_idx].set(tco)
    w = jnp.ones((C1,), jnp.float32).at[-1].set(eos_coef)
    logp = jax.nn.log_softmax(pred_logits.reshape(B * Q, C1), axis=-1)
    tc = target_classes.reshape(-1)
    nll = -jnp.take_along_axis(logp, tc[:, None], axis=-1)[:, 0]
    wt = w[tc]
    loss_ce = jnp.sum(nll * wt) / jnp.sum(wt)

    tao = jnp.concatenate(
        [t['action_labels'][J] for t, (_, J) in zip(targets, indices)], axis=0)
    act = pred_actions[batch_idx, src_idx]
    loss_action = jnp.mean(-jnp.sum(tao * jax.nn.log_softmax(act, -1), axis=-1))

    sb = pred_boxes[batch_idx, src_idx]
    tb = jnp.concatenate(
        [t['boxes_xyxy'][i] for t, (_, i) in zip(targets, indices)], axis=0)
    sz = jnp.concatenate([t['image_size_xyxy_tgt'] for t in targets], axis=0)
    num_boxes = max(float(sum(int(t['labels'].shape[0]) for t in targets)), 1.0)

    area_s = (sb[:, 2] - sb[:, 0]) * (sb[:, 3] - sb[:, 1])
    area_t = (tb[:, 2] - tb[:, 0]) * (tb[:, 3] - tb[:, 1])
    iw = jnp.maximum(jnp.minimum(sb[:, 2], tb[:, 2]) - jnp.maximum(sb[:, 0], tb[:, 0]), 0.0)
    ih = jnp.maximum(jnp.minimum(sb[:, 3], tb[:, 3]) - jnp.maximum(sb[:, 1], tb[:, 1]), 0.0)
    inter = iw * ih
    union = area_s + area_t - inter
    iou = inter / union
    cw = jnp.maximum(sb[:, 2], tb[:, 2]) - jnp.minimum(sb[:, 0], tb[:, 0])
    ch = jnp.maximum(sb[:, 3], tb[:, 3]) - jnp.minimum(sb[:, 1], tb[:, 1])
    area_c = cw * ch
    giou = iou - (area_c - union) / area_c
    loss_giou = jnp.sum(1.0 - giou) / num_boxes
    loss_bbox = jnp.sum(jnp.abs(sb / sz - tb / sz)) / num_boxes

    return {'loss_ce': loss_ce, 'loss_action': loss_action,
            'loss_giou': loss_giou, 'loss_bbox': loss_bbox}


# ---------------------------------------------------------------------------
if __name__ == "__main__":
    key = jax.random.PRNGKey(0)
    B, Q, NUM_CLASSES, A, NT = 2, 40, 3, 8, 3   # small synthetic shapes
    C1 = NUM_CLASSES + 1
    W, H = 32.0, 24.0

    ks = jax.random.split(key, 8)

    # Model outputs
    pred_logits = jax.random.normal(ks[0], (B, Q, C1), jnp.float32)
    pred_actions = jax.random.normal(ks[1], (B, Q, A), jnp.float32)
    xy0 = jax.random.uniform(ks[2], (B, Q, 2), jnp.float32,
                             minval=0.0, maxval=W / 2.0)
    wh = jax.random.uniform(ks[3], (B, Q, 2), jnp.float32,
                            minval=1.0, maxval=W / 2.0)
    pred_boxes = jnp.concatenate([xy0, xy0 + wh], axis=-1)   # valid xyxy

    outputs = {
        'pred_logits': pred_logits,
        'pred_boxes': pred_boxes,
        'pred_actions': pred_actions,
    }

    # Targets (NT ground-truth boxes per image)
    targets = []
    for b in range(B):
        kb = jax.random.fold_in(ks[4], b)
        k1, k2, k3, k4 = jax.random.split(kb, 4)
        labels = jax.random.randint(k1, (NT,), 0, NUM_CLASSES, jnp.int32)
        act_ids = jax.random.randint(k2, (NT,), 0, A, jnp.int32)
        action_labels = jax.nn.one_hot(act_ids, A, dtype=jnp.float32)
        txy0 = jax.random.uniform(k3, (NT, 2), jnp.float32,
                                  minval=0.0, maxval=W / 2.0)
        twh = jax.random.uniform(k4, (NT, 2), jnp.float32,
                                 minval=1.0, maxval=W / 2.0)
        boxes_xyxy = jnp.concatenate([txy0, txy0 + twh], axis=-1)
        image_size = jnp.tile(jnp.array([[W, H, W, H]], jnp.float32), (NT, 1))
        targets.append({
            'labels': labels,
            'action_labels': action_labels,
            'boxes_xyxy': boxes_xyxy,
            'image_size_xyxy_tgt': image_size,
        })

    # Deterministic matching indices (Hungarian matcher is external; see TODO)
    indices = [
        (jnp.array([0, 7, 19], jnp.int32), jnp.array([0, 1, 2], jnp.int32)),
        (jnp.array([3, 11, 33], jnp.int32), jnp.array([2, 0, 1], jnp.int32)),
    ]

    # tile_rows=32 exercises the multi-tile accumulator path (BQ=80 -> grid (3,))
    losses = set_criterion_forward(outputs, targets, indices,
                                   num_classes=NUM_CLASSES, eos_coef=0.1,
                                   tile_rows=32)
    losses = jax.tree_util.tree_map(jax.block_until_ready, losses)

    ref = _reference_losses(outputs, targets, indices,
                            num_classes=NUM_CLASSES, eos_coef=0.1)

    for k in losses:
        v = losses[k]
        assert jnp.isfinite(v), f"non-finite loss {k}"
        assert jnp.allclose(v, ref[k], rtol=1e-3, atol=1e-3), \
            f"mismatch {k}: pallas={float(v)} ref={float(ref[k])}"
    print("KERNEL_OK")
</pallas_src>

<mosaic_0001>
module attributes {stable_mosaic.version = 11 : i64} {
  func.func @_set_criterion_kernel(%arg0: i32, %arg1: memref<32x4xf32, #tpu.memory_space<vmem>>, %arg2: memref<6x21xf32, #tpu.memory_space<vmem>>, %arg3: memref<16x6xf32, #tpu.memory_space<vmem>>, %arg4: memref<1x128xf32, #tpu.memory_space<vmem>>, %arg5: memref<1x1xf32, #tpu.memory_space<vmem>>) attributes {dimension_semantics = [#tpu.dimension_semantics<arbitrary>], iteration_bounds = array<i64: 3>, scalar_prefetch = 0 : i64, scratch_operands = 1 : i64, tpu.core_type = #tpu.core_type<tc>, window_params = [{transform_indices = @transform_0, window_bounds = array<i64: 32, 4>}, {pipeline_mode = #tpu.pipeline_mode<synchronous>, transform_indices = @transform_1, window_bounds = array<i64: 6, 21>}, {pipeline_mode = #tpu.pipeline_mode<synchronous>, transform_indices = @transform_2, window_bounds = array<i64: 16, 6>}, {pipeline_mode = #tpu.pipeline_mode<synchronous>, transform_indices = @transform_3, window_bounds = array<i64: 1, 128>}]} {
    %c0_i32 = arith.constant 0 : i32
    %0 = arith.cmpi eq, %arg0, %c0_i32 : i32
    %1 = arith.extui %0 : i1 to i32
    %c0_i32_0 = arith.constant 0 : i32
    %2 = arith.cmpi ne, %1, %c0_i32_0 : i32
    scf.if %2 {
      %cst_11 = arith.constant 0.000000e+00 : f32
      %36 = vector.broadcast %cst_11 : f32 to vector<1x1xf32>
      %c0_12 = arith.constant 0 : index
      %c0_13 = arith.constant 0 : index
      %37 = vector.load %arg5[%c0_12, %c0_13] : memref<1x1xf32, #tpu.memory_space<vmem>>, vector<1x1xf32>
      tpu.vector_store %arg5[%c0_12, %c0_13], %36 {strides = array<i32>} : memref<1x1xf32, #tpu.memory_space<vmem>>, vector<1x1xf32>,
    } else {
    }
    %c0 = arith.constant 0 : index
    %c0_1 = arith.constant 0 : index
    %3 = vector.load %arg1[%c0, %c0_1] : memref<32x4xf32, #tpu.memory_space<vmem>>, vector<32x4xf32>
    %cst = arith.constant dense<0xFF800000> : vector<32xf32>
    %4 = vector.multi_reduction <maximumf>, %3, %cst [1] : vector<32x4xf32> to vector<32xf32>
    %5 = vector.shape_cast %4 : vector<32xf32> to vector<32x1xf32>
    %6 = vector.broadcast %5 : vector<32x1xf32> to vector<32x4xf32>
    %7 = arith.subf %3, %6 : vector<32x4xf32>
    %8 = math.exp %7 : vector<32x4xf32>
    %cst_2 = arith.constant dense<0.000000e+00> : vector<32xf32>
    %9 = vector.multi_reduction <add>, %8, %cst_2 [1] : vector<32x4xf32> to vector<32xf32>
    %10 = vector.shape_cast %9 : vector<32xf32> to vector<32x1xf32>
    %11 = math.log %10 : vector<32x1xf32>
    %12 = arith.addf %5, %11 : vector<32x1xf32>
    %13 = vector.extract_strided_slice %3 {offsets = [0, 3], sizes = [32, 1], strides = [1, 1]} : vector<32x4xf32> to vector<32x1xf32>
    %c32_i32 = arith.constant 32 : i32
    %14 = arith.muli %arg0, %c32_i32 : i32
    %15 = tpu.iota {dimensions = array<i32: 0>} : vector<32x1xi32>
    %16 = vector.broadcast %14 : i32 to vector<32x1xi32>
    %17 = arith.addi %16, %15 : vector<32x1xi32>
    %c80_i32 = arith.constant 80 : i32
    %18 = vector.broadcast %c80_i32 : i32 to vector<32x1xi32>
    %19 = arith.cmpi slt, %17, %18 : vector<32x1xi32>
    %20 = arith.subf %12, %13 : vector<32x1xf32>
    %cst_3 = arith.constant 0.000000e+00 : f32
    %21 = vector.broadcast %cst_3 : f32 to vector<32x1xf32>
    %22 = arith.select %19, %20, %21 : vector<32x1xi1>, vector<32x1xf32>
    %c0_4 = arith.constant 0 : index
    %c0_5 = arith.constant 0 : index
    %23 = vector.load %arg5[%c0_4, %c0_5] : memref<1x1xf32, #tpu.memory_space<vmem>>, vector<1x1xf32>
    %24 = vector.shape_cast %22 : vector<32x1xf32> to vector<1x32x1xf32>
    %cst_6 = arith.constant dense<0.000000e+00> : vector<1xf32>
    %25 = vector.multi_reduction <add>, %24, %cst_6 [1, 2] : vector<1x32x1xf32> to vector<1xf32>
    %26 = vector.shape_cast %25 : vector<1xf32> to vector<1x1x1xf32>
    %27 = vector.extract %26[0, 0, 0] : f32 from vector<1x1x1xf32>
    %28 = vector.broadcast %27 : f32 to vector<1x1xf32>
    %cst_7 = arith.constant 1.000000e-01 : f32
    %29 = vector.broadcast %cst_7 : f32 to vector<1x1xf32>
    %30 = arith.mulf %29, %28 : vector<1x1xf32>
    %31 = arith.addf %23, %30 : vector<1x1xf32>
    %c0_8 = arith.constant 0 : index
    %c0_9 = arith.constant 0 : index
    %32 = vector.load %arg5[%c0_8, %c0_9] : memref<1x1xf32, #tpu.memory_space<vmem>>, vector<1x1xf32>
    tpu.vector_store %arg5[%c0_8, %c0_9], %31 {strides = array<i32>} : memref<1x1xf32, #tpu.memory_space<vmem>>, vector<1x1xf32>,
    %c2_i32 = arith.constant 2 : i32
    %33 = arith.cmpi eq, %arg0, %c2_i32 : i32
    %34 = arith.extui %33 : i1 to i32
    %c0_i32_10 = arith.constant 0 : i32
    %35 = arith.cmpi ne, %34, %c0_i32_10 : i32
    scf.if %35 {
      %c0_11 = arith.constant 0 : index
      %c0_12 = arith.constant 0 : index
      %36 = vector.load %arg2[%c0_11, %c0_12] : memref<6x21xf32, #tpu.memory_space<vmem>>, vector<6x21xf32>
      %37 = vector.extract_strided_slice %36 {offsets = [0, 0], sizes = [6, 4], strides = [1, 1]} : vector<6x21xf32> to vector<6x4xf32>
      %38 = vector.extract_strided_slice %36 {offsets = [0, 4], sizes = [6, 1], strides = [1, 1]} : vector<6x21xf32> to vector<6x1xf32>
      %39 = arith.fptosi %38 : vector<6x1xf32> to vector<6x1xi32>
      %40 = vector.extract_strided_slice %36 {offsets = [0, 5], sizes = [6, 8], strides = [1, 1]} : vector<6x21xf32> to vector<6x8xf32>
      %41 = vector.extract_strided_slice %36 {offsets = [0, 13], sizes = [6, 8], strides = [1, 1]} : vector<6x21xf32> to vector<6x8xf32>
      %cst_13 = arith.constant dense<0xFF800000> : vector<6xf32>
      %42 = vector.multi_reduction <maximumf>, %37, %cst_13 [1] : vector<6x4xf32> to vector<6xf32>
      %43 = vector.shape_cast %42 : vector<6xf32> to vector<6x1xf32>
      %44 = vector.broadcast %43 : vector<6x1xf32> to vector<6x4xf32>
      %45 = arith.subf %37, %44 : vector<6x4xf32>
      %46 = math.exp %45 : vector<6x4xf32>
      %cst_14 = arith.constant dense<0.000000e+00> : vector<6xf32>
      %47 = vector.multi_reduction <add>, %46, %cst_14 [1] : vector<6x4xf32> to vector<6xf32>
      %48 = vector.shape_cast %47 : vector<6xf32> to vector<6x1xf32>
      %49 = math.log %48 : vector<6x1xf32>
      %50 = arith.addf %43, %49 : vector<6x1xf32>
      %51 = vector.extract_strided_slice %37 {offsets = [0, 3], sizes = [6, 1], strides = [1, 1]} : vector<6x4xf32> to vector<6x1xf32>
      %52 = tpu.iota {dimensions = array<i32: 1>} : vector<6x4xi32>
      %53 = vector.broadcast %39 : vector<6x1xi32> to vector<6x4xi32>
      %54 = arith.cmpi eq, %52, %53 : vector<6x4xi32>
      %cst_15 = arith.constant 0.000000e+00 : f32
      %55 = vector.broadcast %cst_15 : f32 to vector<6x4xf32>
      %56 = arith.select %54, %37, %55 : vector<6x4xi1>, vector<6x4xf32>
      %cst_16 = arith.constant dense<0.000000e+00> : vector<6xf32>
      %57 = vector.multi_reduction <add>, %56, %cst_16 [1] : vector<6x4xf32> to vector<6xf32>
      %58 = vector.shape_cast %57 : vector<6xf32> to vector<6x1xf32>
      %cst_17 = arith.constant 0.899999976 : f32
      %59 = vector.broadcast %cst_17 : f32 to vector<6x1xf32>
      %60 = arith.mulf %59, %50 : vector<6x1xf32>
      %61 = arith.subf %60, %58 : vector<6x1xf32>
      %cst_18 = arith.constant 1.000000e-01 : f32
      %62 = vector.broadcast %cst_18 : f32 to vector<6x1xf32>
      %63 = arith.mulf %62, %51 : vector<6x1xf32>
      %64 = arith.addf %61, %63 : vector<6x1xf32>
      %65 = vector.shape_cast %64 : vector<6x1xf32> to vector<1x6x1xf32>
      %cst_19 = arith.constant dense<0.000000e+00> : vector<1xf32>
      %66 = vector.multi_reduction <add>, %65, %cst_19 [1, 2] : vector<1x6x1xf32> to vector<1xf32>
      %67 = vector.shape_cast %66 : vector<1xf32> to vector<1x1x1xf32>
      %68 = vector.extract %67[0, 0, 0] : f32 from vector<1x1x1xf32>
      %69 = vector.broadcast %68 : f32 to vector<1x1xf32>
      %c0_20 = arith.constant 0 : index
      %c0_21 = arith.constant 0 : index
      %70 = vector.load %arg5[%c0_20, %c0_21] : memref<1x1xf32, #tpu.memory_space<vmem>>, vector<1x1xf32>
      %71 = arith.addf %70, %69 : vector<1x1xf32>
      %cst_22 = arith.constant 0.074626863 : f32
      %72 = vector.broadcast %cst_22 : f32 to vector<1x1xf32>
      %73 = arith.mulf %71, %72 : vector<1x1xf32>
      %cst_23 = arith.constant dense<0xFF800000> : vector<6xf32>
      %74 = vector.multi_reduction <maximumf>, %40, %cst_23 [1] : vector<6x8xf32> to vector<6xf32>
      %75 = vector.shape_cast %74 : vector<6xf32> to vector<6x1xf32>
      %76 = vector.broadcast %75 : vector<6x1xf32> to vector<6x8xf32>
      %77 = arith.subf %40, %76 : vector<6x8xf32>
      %78 = math.exp %77 : vector<6x8xf32>
      %cst_24 = arith.constant dense<0.000000e+00> : vector<6xf32>
      %79 = vector.multi_reduction <add>, %78, %cst_24 [1] : vector<6x8xf32> to vector<6xf32>
      %80 = vector.shape_cast %79 : vector<6xf32> to vector<6x1xf32>
      %81 = math.log %80 : vector<6x1xf32>
      %82 = arith.addf %75, %81 : vector<6x1xf32>
      %83 = vector.broadcast %82 : vector<6x1xf32> to vector<6x8xf32>
      %84 = arith.subf %40, %83 : vector<6x8xf32>
      %85 = arith.mulf %41, %84 : vector<6x8xf32>
      %cst_25 = arith.constant dense<0.000000e+00> : vector<6xf32>
      %86 = vector.multi_reduction <add>, %85, %cst_25 [1] : vector<6x8xf32> to vector<6xf32>
      %87 = vector.shape_cast %86 : vector<6xf32> to vector<6x1xf32>
      %cst_26 = arith.constant 0.000000e+00 : f32
      %88 = vector.broadcast %cst_26 : f32 to vector<6x1xf32>
      %89 = arith.subf %88, %87 : vector<6x1xf32>
      %90 = vector.shape_cast %89 : vector<6x1xf32> to vector<1x6x1xf32>
      %cst_27 = arith.constant dense<0.000000e+00> : vector<1xf32>
      %91 = vector.multi_reduction <add>, %90, %cst_27 [1, 2] : vector<1x6x1xf32> to vector<1xf32>
      %92 = vector.shape_cast %91 : vector<1xf32> to vector<1x1x1xf32>
      %93 = vector.extract %92[0, 0, 0] : f32 from vector<1x1x1xf32>
      %94 = vector.broadcast %93 : f32 to vector<1x1xf32>
      %cst_28 = arith.constant 0.166666672 : f32
      %95 = vector.broadcast %cst_28 : f32 to vector<1x1xf32>
      %96 = arith.mulf %94, %95 : vector<1x1xf32>
      %c0_29 = arith.constant 0 : index
      %c0_30 = arith.constant 0 : index
      %97 = vector.load %arg3[%c0_29, %c0_30] : memref<16x6xf32, #tpu.memory_space<vmem>>, vector<16x6xf32>
      %98 = vector.extract_strided_slice %97 {offsets = [0, 0], sizes = [1, 6], strides = [1, 1]} : vector<16x6xf32> to vector<1x6xf32>
      %99 = vector.extract_strided_slice %97 {offsets = [1, 0], sizes = [1, 6], strides = [1, 1]} : vector<16x6xf32> to vector<1x6xf32>
      %100 = vector.extract_strided_slice %97 {offsets = [2, 0], sizes = [1, 6], strides = [1, 1]} : vector<16x6xf32> to vector<1x6xf32>
      %101 = vector.extract_strided_slice %97 {offsets = [3, 0], sizes = [1, 6], strides = [1, 1]} : vector<16x6xf32> to vector<1x6xf32>
      %102 = vector.extract_strided_slice %97 {offsets = [4, 0], sizes = [1, 6], strides = [1, 1]} : vector<16x6xf32> to vector<1x6xf32>
      %103 = vector.extract_strided_slice %97 {offsets = [5, 0], sizes = [1, 6], strides = [1, 1]} : vector<16x6xf32> to vector<1x6xf32>
      %104 = vector.extract_strided_slice %97 {offsets = [6, 0], sizes = [1, 6], strides = [1, 1]} : vector<16x6xf32> to vector<1x6xf32>
      %105 = vector.extract_strided_slice %97 {offsets = [7, 0], sizes = [1, 6], strides = [1, 1]} : vector<16x6xf32> to vector<1x6xf32>
      %106 = vector.extract_strided_slice %97 {offsets = [0, 0], sizes = [4, 6], strides = [1, 1]} : vector<16x6xf32> to vector<4x6xf32>
      %107 = vector.extract_strided_slice %97 {offsets = [4, 0], sizes = [4, 6], strides = [1, 1]} : vector<16x6xf32> to vector<4x6xf32>
      %108 = vector.extract_strided_slice %97 {offsets = [8, 0], sizes = [4, 6], strides = [1, 1]} : vector<16x6xf32> to vector<4x6xf32>
      %109 = arith.subf %100, %98 : vector<1x6xf32>
      %110 = arith.subf %101, %99 : vector<1x6xf32>
      %111 = arith.mulf %109, %110 : vector<1x6xf32>
      %112 = arith.subf %104, %102 : vector<1x6xf32>
      %113 = arith.subf %105, %103 : vector<1x6xf32>
      %114 = arith.mulf %112, %113 : vector<1x6xf32>
      %115 = arith.minimumf %100, %104 : vector<1x6xf32>
      %116 = arith.maximumf %98, %102 : vector<1x6xf32>
      %117 = arith.subf %115, %116 : vector<1x6xf32>
      %cst_31 = arith.constant 0.000000e+00 : f32
      %118 = vector.broadcast %cst_31 : f32 to vector<1x6xf32>
      %119 = arith.maximumf %117, %118 : vector<1x6xf32>
      %120 = arith.minimumf %101, %105 : vector<1x6xf32>
      %121 = arith.maximumf %99, %103 : vector<1x6xf32>
      %122 = arith.subf %120, %121 : vector<1x6xf32>
      %cst_32 = arith.constant 0.000000e+00 : f32
      %123 = vector.broadcast %cst_32 : f32 to vector<1x6xf32>
      %124 = arith.maximumf %122, %123 : vector<1x6xf32>
      %125 = arith.mulf %119, %124 : vector<1x6xf32>
      %126 = arith.addf %111, %114 : vector<1x6xf32>
      %127 = arith.subf %126, %125 : vector<1x6xf32>
      %cst_33 = arith.constant 0.000000e+00 : f32
      %128 = vector.broadcast %cst_33 : f32 to vector<1x6xf32>
      %129 = arith.cmpf ogt, %127, %128 : vector<1x6xf32>
      %cst_34 = arith.constant 1.000000e+00 : f32
      %130 = vector.broadcast %cst_34 : f32 to vector<1x6xf32>
      %131 = arith.select %129, %127, %130 : vector<1x6xi1>, vector<1x6xf32>
      %132 = tpu.reciprocal %131 : vector<1x6xf32> -> vector<1x6xf32>
      %133 = arith.mulf %125, %132 : vector<1x6xf32>
      %134 = arith.maximumf %100, %104 : vector<1x6xf32>
      %135 = arith.minimumf %98, %102 : vector<1x6xf32>
      %136 = arith.subf %134, %135 : vector<1x6xf32>
      %137 = arith.maximumf %101, %105 : vector<1x6xf32>
      %138 = arith.minimumf %99, %103 : vector<1x6xf32>
      %139 = arith.subf %137, %138 : vector<1x6xf32>
      %cst_35 = arith.constant 0.000000e+00 : f32
      %140 = vector.broadcast %cst_35 : f32 to vector<1x6xf32>
      %141 = arith.maximumf %136, %140 : vector<1x6xf32>
      %cst_36 = arith.constant 0.000000e+00 : f32
      %142 = vector.broadcast %cst_36 : f32 to vector<1x6xf32>
      %143 = arith.maximumf %139, %142 : vector<1x6xf32>
      %144 = arith.mulf %141, %143 : vector<1x6xf32>
      %145 = arith.subf %144, %127 : vector<1x6xf32>
      %cst_37 = arith.constant 0.000000e+00 : f32
      %146 = vector.broadcast %cst_37 : f32 to vector<1x6xf32>
      %147 = arith.cmpf ogt, %144, %146 : vector<1x6xf32>
      %cst_38 = arith.constant 1.000000e+00 : f32
      %148 = vector.broadcast %cst_38 : f32 to vector<1x6xf32>
      %149 = arith.select %147, %144, %148 : vector<1x6xi1>, vector<1x6xf32>
      %150 = tpu.reciprocal %149 : vector<1x6xf32> -> vector<1x6xf32>
      %151 = arith.mulf %145, %150 : vector<1x6xf32>
      %152 = arith.subf %133, %151 : vector<1x6xf32>
      %cst_39 = arith.constant 1.000000e+00 : f32
      %153 = vector.broadcast %cst_39 : f32 to vector<1x6xf32>
      %154 = arith.subf %153, %152 : vector<1x6xf32>
      %155 = vector.shape_cast %154 : vector<1x6xf32> to vector<1x1x6xf32>
      %cst_40 = arith.constant dense<0.000000e+00> : vector<1xf32>
      %156 = vector.multi_reduction <add>, %155, %cst_40 [1, 2] : vector<1x1x6xf32> to vector<1xf32>
      %157 = vector.shape_cast %156 : vector<1xf32> to vector<1x1x1xf32>
      %158 = vector.extract %157[0, 0, 0] : f32 from vector<1x1x1xf32>
      %159 = vector.broadcast %158 : f32 to vector<1x1xf32>
      %cst_41 = arith.constant 0.166666672 : f32
      %160 = vector.broadcast %cst_41 : f32 to vector<1x1xf32>
      %161 = arith.mulf %159, %160 : vector<1x1xf32>
      %162 = tpu.reciprocal %108 : vector<4x6xf32> -> vector<4x6xf32>
      %163 = arith.subf %106, %107 : vector<4x6xf32>
      %164 = math.absf %163 : vector<4x6xf32>
      %165 = arith.mulf %164, %162 : vector<4x6xf32>
      %166 = vector.shape_cast %165 : vector<4x6xf32> to vector<1x4x6xf32>
      %cst_42 = arith.constant dense<0.000000e+00> : vector<1xf32>
      %167 = vector.multi_reduction <add>, %166, %cst_42 [1, 2] : vector<1x4x6xf32> to vector<1xf32>
      %168 = vector.shape_cast %167 : vector<1xf32> to vector<1x1x1xf32>
      %169 = vector.extract %168[0, 0, 0] : f32 from vector<1x1x1xf32>
      %170 = vector.broadcast %169 : f32 to vector<1x1xf32>
      %cst_43 = arith.constant 0.166666672 : f32
      %171 = vector.broadcast %cst_43 : f32 to vector<1x1xf32>
      %172 = arith.mulf %170, %171 : vector<1x1xf32>
      %173 = tpu.iota {dimensions = array<i32: 1>} : vector<1x128xi32>
      %c0_i32_44 = arith.constant 0 : i32
      %174 = vector.broadcast %c0_i32_44 : i32 to vector<1x128xi32>
      %175 = arith.cmpi eq, %173, %174 : vector<1x128xi32>
      %cst_45 = arith.constant 0.000000e+00 : f32
      %176 = vector.shape_cast %73 : vector<1x1xf32> to vector<1x1xf32>
      %177 = vector.broadcast %176 : vector<1x1xf32> to vector<1x128xf32>
      %178 = vector.broadcast %cst_45 : f32 to vector<1x128xf32>
      %179 = arith.select %175, %177, %178 : vector<1x128xi1>, vector<1x128xf32>
      %c1_i32 = arith.constant 1 : i32
      %180 = vector.broadcast %c1_i32 : i32 to vector<1x128xi32>
      %181 = arith.cmpi eq, %173, %180 : vector<1x128xi32>
      %cst_46 = arith.constant 0.000000e+00 : f32
      %182 = vector.shape_cast %96 : vector<1x1xf32> to vector<1x1xf32>
      %183 = vector.broadcast %182 : vector<1x1xf32> to vector<1x128xf32>
      %184 = vector.broadcast %cst_46 : f32 to vector<1x128xf32>
      %185 = arith.select %181, %183, %184 : vector<1x128xi1>, vector<1x128xf32>
      %186 = arith.addf %179, %185 : vector<1x128xf32>
      %c2_i32_47 = arith.constant 2 : i32
      %187 = vector.broadcast %c2_i32_47 : i32 to vector<1x128xi32>
      %188 = arith.cmpi eq, %173, %187 : vector<1x128xi32>
      %cst_48 = arith.constant 0.000000e+00 : f32
      %189 = vector.shape_cast %161 : vector<1x1xf32> to vector<1x1xf32>
      %190 = vector.broadcast %189 : vector<1x1xf32> to vector<1x128xf32>
      %191 = vector.broadcast %cst_48 : f32 to vector<1x128xf32>
      %192 = arith.select %188, %190, %191 : vector<1x128xi1>, vector<1x128xf32>
      %193 = arith.addf %186, %192 : vector<1x128xf32>
      %c3_i32 = arith.constant 3 : i32
      %194 = vector.broadcast %c3_i32 : i32 to vector<1x128xi32>
      %195 = arith.cmpi eq, %173, %194 : vector<1x128xi32>
      %cst_49 = arith.constant 0.000000e+00 : f32
      %196 = vector.shape_cast %172 : vector<1x1xf32> to vector<1x1xf32>
      %197 = vector.broadcast %196 : vector<1x1xf32> to vector<1x128xf32>
      %198 = vector.broadcast %cst_49 : f32 to vector<1x128xf32>
      %199 = arith.select %195, %197, %198 : vector<1x128xi1>, vector<1x128xf32>
      %200 = arith.addf %193, %199 : vector<1x128xf32>
      %c0_50 = arith.constant 0 : index
      %c0_51 = arith.constant 0 : index
      %201 = vector.load %arg4[%c0_50, %c0_51] : memref<1x128xf32, #tpu.memory_space<vmem>>, vector<1x128xf32>
      tpu.vector_store %arg4[%c0_50, %c0_51], %200 {strides = array<i32>} : memref<1x128xf32, #tpu.memory_space<vmem>>, vector<1x128xf32>,
    } else {
    }
    return
  }
  func.func @transform_0(%arg0: i32) -> (i32, i32) {
    %c0_i32 = arith.constant 0 : i32
    %c0_i32_0 = arith.constant 0 : i32
    return %arg0, %c0_i32 : i32, i32
  }
  func.func @transform_1(%arg0: i32) -> (i32, i32) {
    %c0_i32 = arith.constant 0 : i32
    %c0_i32_0 = arith.constant 0 : i32
    %c0_i32_1 = arith.constant 0 : i32
    return %c0_i32, %c0_i32_0 : i32, i32
  }
  func.func @transform_2(%arg0: i32) -> (i32, i32) {
    %c0_i32 = arith.constant 0 : i32
    %c0_i32_0 = arith.constant 0 : i32
    %c0_i32_1 = arith.constant 0 : i32
    return %c0_i32, %c0_i32_0 : i32, i32
  }
  func.func @transform_3(%arg0: i32) -> (i32, i32) {
    %c0_i32 = arith.constant 0 : i32
    %c0_i32_0 = arith.constant 0 : i32
    %c0_i32_1 = arith.constant 0 : i32
    return %c0_i32, %c0_i32_0 : i32, i32
  }
}

</mosaic_0001>

<bundles_post_ra>
// kernel: tpu_custom_call.1
= control target key start
LH: loop header
LB: loop body
LE: loop exit
PB: predicated region body
PF: predicated region fallthrough
CT: control target
= control target key end

     0   :  { %8 = vsyncpa [#allocation4], 0  ;;  %s670_s12 = smov 0   ;;  %s762_s0 = inlined_call_operand.vmem [shape: f32[96,4], index: 0, kind: input, shape index: {}]   ;;  %s763_s1 = inlined_call_operand.vmem [shape: f32[6,21], index: 1, kind: input, shape index: {}]   ;;  %s764_s2 = inlined_call_operand.vmem [shape: f32[16,6], index: 2, kind: input, shape index: {}]   ;;  %s765_s3 = inlined_call_operand.hbm [shape: f32[1,128], index: 3, kind: output, shape index: {}]  }
   0x1 LB: > { %s676_s13 = sadd.s32 4294967295, %s639_s12   ;;  %p527_p0 = scmp.ge.s32.totalorder %s639_s12, 1  ;;  %s639_s12 = sphi %s670_s12, %s14_s12  }
   0x2   : > { %p134_p1 = scmp.lt.s32.totalorder %s639_s12, 4 }
   0x4   : > { %p135_p2 = pnand %p527_p0, %p134_p1 }
   0x5   : > { %s528_s14 = sshll.u32 (!%p135_p2), %s676_s13, 2  ;;  %p530_p4 = scmp.ne.s32.totalorder (!%p135_p2), %s676_s13, 0 }
   0x6   : > { %138 = sbr.rel (%p135_p2) target bundleno = 1718 (0x6b6), region = 32  ;;  %p154_p3 = scmp.lt.s32.totalorder (!%p135_p2), %s528_s14, 11 }
   0xb   : > { %s767_s14 = smov (!%p154_p3, %s528_s14), 11  ;;  %162 = sbr.rel (%p530_p4) target bundleno = 18 (0x12), region = 36 }
   0xc   : > { %s529_s15 = sshll.u32 %s767_s14, 3 }
   0xd   : > { %s157_s18 = scalar_lea.vmem %s762_s0, %s529_s15 }
  0x10   : > { %vm163_vm0 = vcmask 0   ;;  %v641_v0 = vmov 0.0  }
  0x11   : > { %164 = vst.msk [vmem:[#allocation2] sm:$0x1] %vm163_vm0, %v641_v0 }
  0x12 PF: > { %v685_v1 = vld [vmem:[%s157_s18] sm:$0xff]  ;;  %vm169_vm1 = vcmask 31744   ;;  %v687_v2 = vld [vmem:[%s157_s18 + $0x10] sm:$0xff]  ;;  %v689_v3 = vld [vmem:[%s157_s18 + $0x8] sm:$0xff]  ;;  %v219_v32 = vlaneseq  ;;  %s531_s19 = sshll.u32 %s676_s13, 5  ;;  %s642_s20 = smov 125  }
  0x13   : > { %v170_v4 = vsel %vm169_vm1, %v685_v1, -inf  ;;  %v176_v5 = vsel %vm169_vm1, %v687_v2, -inf  ;;  %v695_v6 = vld [vmem:[%s157_s18 + $0x18] sm:$0xff]  ;;  %v173_v7 = vsel %vm169_vm1, %v689_v3, -inf  ;;  %v224_v35 = vstv %s531_s19  ;;  %p532_p5 = scmp.ne.s32.totalorder %s676_s13, 2 }
  0x14   : > { %171 = vmax.xlane.f32.xlu0 %v170_v4  ;;  %177 = vmax.xlane.f32.xlu1 %v176_v5  ;;  %v179_v8 = vsel %vm169_vm1, %v695_v6, -inf  ;;  %v711_v34 = vshrl.u32 %v219_v32, 7  ;;  %vm258_vm6 = vcmask 7168   ;;  %vm278_vm7 = vcmask 0   ;;  %s644_s24 = smov (!%p532_p5), 123   ;;  %s645_s25 = smov (!%p532_p5), 8  }
  0x15   : > { %s646_s26 = smov (!%p532_p5), 115   ;;  %s647_s27 = smov (!%p532_p5), 125  }
  0x16   : > { %v225_v37 = vadd.s32 %v224_v35, %v711_v34  ;;  %v221_v38 = vadd.s32 8, %v711_v34  ;;  %v222_v43 = vadd.s32 16, %v711_v34  ;;  %v223_v53 = vadd.s32 24, %v711_v34 }
  0x18   : > { %174 = vmax.xlane.f32.xlu0 %v173_v7  ;;  %180 = vmax.xlane.f32.xlu1 %v179_v8  ;;  %vm229_vm2 = vcmp.lt.s32.totalorder %v225_v37, 80  ;;  %v226_v42 = vadd.s32 %v224_v35, %v221_v38  ;;  %v227_v52 = vadd.s32 %v224_v35, %v222_v43  ;;  %v228_v59 = vadd.s32 %v224_v35, %v223_v53 }
  0x1a   : > { %vm230_vm3 = vcmp.lt.s32.totalorder %v226_v42, 80  ;;  %vm231_vm4 = vcmp.lt.s32.totalorder %v227_v52, 80  ;;  %vm232_vm5 = vcmp.lt.s32.totalorder %v228_v59, 80 }
  0x9d   : > { %v172_v9 = vpop.xlane.xlu0 %171  ;;  %v178_v10 = vpop.xlane.xlu1 %177 }
  0x9e   : > { %v182_v11 = vsub.f32 %v685_v1, %v172_v9  ;;  %v184_v12 = vsub.f32 %v687_v2, %v178_v10 }
  0xa0   : > { %v186_v13 = vmul.f32 1.442695, %v182_v11  ;;  %v190_v14 = vmul.f32 1.442695, %v184_v12 }
  0xa1   : > { %v175_v15 = vpop.xlane.xlu0 %174  ;;  %v181_v16 = vpop.xlane.xlu1 %180 }
  0xa2   : > { %572 = vpow2.f32 %v186_v13  ;;  %v183_v17 = vsub.f32 %v689_v3, %v175_v15  ;;  %v185_v18 = vsub.f32 %v695_v6, %v181_v16 }
  0xa3   : > { %574 = vpow2.f32 %v190_v14 }
  0xa4   : > { %v188_v19 = vmul.f32 1.442695, %v183_v17  ;;  %v192_v20 = vmul.f32 1.442695, %v185_v18  ;;  %v241_v17 = vld [vmem:[#allocation2] sm:$0x1] }
  0xa6   : > { %576 = vpow2.f32 %v188_v19 }
  0xa7   : > { %578 = vpow2.f32 %v192_v20 }
  0xaf   : > { %v573_v21 = vpop.eup %572 }
  0xb0   : > { %v575_v22 = vpop.eup %574  ;;  %v194_v23 = vsel %vm169_vm1, %v573_v21, 0.0 }
  0xb1   : > { %195 = vadd.xlane.f32.xlu0 %v194_v23  ;;  %v200_v24 = vsel %vm169_vm1, %v575_v22, 0.0 }
  0xb3   : > { %v577_v25 = vpop.eup %576 }
  0xb4   : > { %v579_v26 = vpop.eup %578  ;;  %v197_v27 = vsel %vm169_vm1, %v577_v25, 0.0 }
  0xb5   : > { %201 = vadd.xlane.f32.xlu0 %v200_v24  ;;  %198 = vadd.xlane.f32.xlu1 %v197_v27  ;;  %v203_v28 = vsel %vm169_vm1, %v579_v26, 0.0 }
  0xb9   : > { %204 = vadd.xlane.f32.xlu1 %v203_v28 }
 0x13a   : > { %v196_v29 = vpop.xlane.xlu0 %195 }
 0x13b   : > { %580 = vlog2.f32 %v196_v29 }
 0x13e   : > { %v199_v30 = vpop.xlane.xlu1 %198  ;;  %v202_v31 = vpop.xlane.xlu0 %201 }
 0x13f   : > { %582 = vlog2.f32 %v199_v30 }
 0x140   : > { %584 = vlog2.f32 %v202_v31 }
 0x142   : > { %v205_v33 = vpop.xlane.xlu1 %204 }
 0x143   : > { %586 = vlog2.f32 %v205_v33 }
 0x148   : > { %v581_v36 = vpop.eup %580 }
 0x149   : > { %v207_v39 = vmul.f32 0.6931472, %v581_v36 }
 0x14b   : > { %v214_v40 = vadd.f32 %v207_v39, %v172_v9 }
 0x14c   : > { %v583_v41 = vpop.eup %582 }
 0x14d   : > { %v585_v44 = vpop.eup %584  ;;  %v209_v45 = vmul.f32 0.6931472, %v583_v41  ;;  %v233_v46 = vsub.f32 %v214_v40, %v685_v1 }
 0x14e   : > { %v211_v47 = vmul.f32 0.6931472, %v585_v44 }
 0x14f   : > { %v237_v48 = vsel %vm229_vm2, %v233_v46, 0.0  ;;  %v215_v49 = vadd.f32 %v209_v45, %v175_v15 }
 0x150   : > { %v587_v50 = vpop.eup %586  ;;  %246 = vrot.lane.b32.xlu0 %v237_v48, %s642_s20  ;;  %v216_v51 = vadd.f32 %v211_v47, %v178_v10 }
 0x151   : > { %v213_v54 = vmul.f32 0.6931472, %v587_v50  ;;  %v234_v55 = vsub.f32 %v215_v49, %v689_v3 }
 0x152   : > { %v235_v57 = vsub.f32 %v216_v51, %v687_v2 }
 0x153   : > { %v238_v56 = vsel %vm230_vm3, %v234_v55, 0.0  ;;  %v217_v58 = vadd.f32 %v213_v54, %v181_v16 }
 0x154   : > { %248 = vrot.lane.b32.xlu1 %v238_v56, %s642_s20  ;;  %v239_v60 = vsel %vm231_vm4, %v235_v57, 0.0 }
 0x155   : > { %v236_v61 = vsub.f32 %v217_v58, %v695_v6 }
 0x157   : > { %v240_v62 = vsel %vm232_vm5, %v236_v61, 0.0 }
 0x158   : > { %250 = vrot.lane.b32.xlu1 %v239_v60, %s642_s20 }
 0x15c   : > { %252 = vrot.lane.b32.xlu1 %v240_v62, %s642_s20 }
 0x1c2   : > { %v247_v0 = vpop.permute.xlu0 %246 }
 0x1c3   : > { %v259_v3 = vsel %vm258_vm6, %v247_v0, 0.0 }
 0x1c6   : > { %v249_v63 = vpop.permute.xlu1 %248 }
 0x1c7   : > { %v260_v1 = vsel %vm258_vm6, %v249_v63, 0.0 }
 0x1c8   : > { %v261_v7 = vadd.f32 %v260_v1, %v259_v3 }
 0x1ca   : > { %v251_v4 = vpop.permute.xlu1 %250 }
 0x1cb   : > { %v262_v5 = vsel %vm258_vm6, %v251_v4, 0.0 }
 0x1cc   : > { %v263_v2 = vadd.f32 %v262_v5, %v261_v7 }
 0x1ce   : > { %v253_v8 = vpop.permute.xlu1 %252 }
 0x1cf   : > { %v264_v9 = vsel %vm258_vm6, %v253_v8, 0.0 }
 0x1d0   : > { %v265_v10 = vadd.f32 %v264_v9, %v263_v2 }
 0x1d2   : > { %266 = vadd.xlane.f32.xlu0 %v265_v10 }
 0x25b   : > { %v267_v11 = vpop.xlane.xlu0 %266 }
 0x25c   : > { %v268_v12 = vrot.slane %v267_v11, 4 }
 0x25e   : > { %v269_v6 = vadd.f32 %v268_v12, %v267_v11 }
 0x260   : > { %v270_v13 = vrot.slane %v269_v6, 2 }
 0x262   : > { %v271_v14 = vadd.f32 %v270_v13, %v269_v6 }
 0x264   : > { %v272_v15 = vrot.slane %v271_v14, 1 }
 0x266   : > { %v273_v16 = vadd.f32 %v272_v15, %v271_v14 }
 0x268   : > { %537 = vpush %v273_v16 }
 0x299   : > { %s538_s21 = spop %537 }
 0x29a   : > { %v275_v18 = vstv %s538_s21 }
 0x29b   : > { %v276_v19 = vmul.f32 0.1, %v275_v18  ;;  %283 = sbr.rel (%p532_p5) target bundleno = 1703 (0x6a7), region = 40 }
 0x29d   : > { %v277_v20 = vadd.f32 %v276_v19, %v241_v17 }
 0x29f   : > { %279 = vst.msk [vmem:[#allocation2] sm:$0x1] %vm278_vm7, %v277_v20 }
 0x2a0   : > { %v284_v21 = vld [vmem:[%s763_s1] sm:$0x3f]  ;;  %vm332_vm8 = vcmask 103464   ;;  %vm286_vm9 = vcmask 29696   ;;  %v643_v27 = vmov 4   ;;  %vm343_vm10 = vcmask 62464  }
 0x2a1   : > { %v333_v22 = vsel %vm332_vm8, %v284_v21, -inf  ;;  %v287_v23 = vsel %vm286_vm9, %v284_v21, -inf  ;;  %588 = vset.pattern.permute.xlu1 %v643_v27  ;;  %v539_v31 = vtrunc.f32 %v284_v21  ;;  %v729_v41 = vand.u32 127, %v219_v32  ;;  %v376_v59 = vld [vmem:[%s764_s2] sm:$0xff] }
 0x2a2   : > { %334 = vmax.xlane.f32.xlu0 %v333_v22  ;;  %288 = vmax.xlane.f32.xlu1 %v287_v23  ;;  %v311_v55 = vmul.f32 0.1, %v284_v21  ;;  %v386_v60 = vrot.slane %v376_v59, 4  ;;  %v379_v61 = vrot.slane %v376_v59, 6  ;;  %vm427_vm14 = vcmask 40960  }
 0x2a3   : > { %v540_v33 = vcvt.f32.s32 %v539_v31  ;;  %vm317_vm15 = vcmask 5120   ;;  %v648_v31 = vmov 0   ;;  %vm444_vm0 = vcmask 44032  }
 0x2a4   : > { %v389_v62 = vmax.f32 %v376_v59, %v386_v60  ;;  %v388_v63 = vmin.f32 %v376_v59, %v386_v60  ;;  %v381_v0 = vsub.f32 %v376_v59, %v379_v61  ;;  %590 = vset.pattern.permute.xlu0 %v648_v31  ;;  %vm457_vm1 = vcmp.eq.s32.totalorder %v729_v41, 0 }
 0x2a5   : > { %vm468_vm2 = vcmp.eq.s32.totalorder %v729_v41, 1  ;;  %vm471_vm3 = vcmp.eq.s32.totalorder %v729_v41, 2  ;;  %vm474_vm4 = vcmp.eq.s32.totalorder %v729_v41, 3 }
 0x2a6   : > { %v391_v1 = vrot.slane %v389_v62, 6  ;;  %v409_v4 = vrot.slane %v388_v63, 6  ;;  %v383_v3 = vrot.slane %v381_v0, 1 }
 0x2a8   : > { %v393_v5 = vsub.f32 %v388_v63, %v391_v1  ;;  %v411_v7 = vsub.f32 %v389_v62, %v409_v4  ;;  %v385_v2 = vmul.f32 %v383_v3, %v381_v0 }
 0x2aa   : > { %v394_v8 = vmax.f32 %v393_v5, 0.0  ;;  %v412_v9 = vmax.f32 %v411_v7, 0.0  ;;  %v400_v11 = vrot.slane %v385_v2, 4 }
 0x2ac   : > { %v396_v10 = vrot.slane %v394_v8, 1  ;;  %v414_v12 = vrot.slane %v412_v9, 1  ;;  %v402_v13 = vadd.f32 %v400_v11, %v385_v2 }
 0x2ae   : > { %v398_v6 = vmul.f32 %v396_v10, %v394_v8  ;;  %v416_v14 = vmul.f32 %v414_v12, %v412_v9  ;;  %v465_v12 = vsub.s32 0, %v711_v34 }
 0x2b0   : > { %v403_v15 = vsub.f32 %v402_v13, %v398_v6  ;;  %vm418_vm12 = vcmp.gt.f32.partialorder %v416_v14, 0.0 }
 0x2b1   : > { %v419_v16 = vsel %vm418_vm12, %v416_v14, 1.0 }
 0x2b2   : > { %vm404_vm13 = vcmp.gt.f32.partialorder %v403_v15, 0.0  ;;  %v417_v19 = vsub.f32 %v416_v14, %v403_v15 }
 0x2b3   : > { %v405_v17 = vsel %vm404_vm13, %v403_v15, 1.0 }
 0x32b   : > { %v335_v24 = vpop.xlane.xlu0 %334  ;;  %v289_v35 = vpop.xlane.xlu1 %288 }
 0x32c   : > { %v336_v25 = vsub.f32 %v284_v21, %v335_v24  ;;  %v290_v36 = vsub.f32 %v284_v21, %v289_v35 }
 0x32e   : > { %v337_v26 = vmul.f32 1.442695, %v336_v25  ;;  %v291_v37 = vmul.f32 1.442695, %v290_v36 }
 0x330   : > { %591 = vpow2.f32 %v337_v26 }
 0x331   : > { %593 = vpow2.f32 %v291_v37 }
 0x33d   : > { %v592_v28 = vpop.eup %591 }
 0x33e   : > { %340 = vrot.lane.b32.xlu0 %v592_v28, %s644_s24  ;;  %v594_v38 = vpop.eup %593 }
 0x33f   : > { %v293_v39 = vsel %vm286_vm9, %v594_v38, 0.0 }
 0x3b0   : > { %v341_v29 = vpop.permute.xlu0 %340 }
 0x3b1   : > { %v344_v30 = vsel %vm343_vm10, %v341_v29, 0.0 }
 0x3b2   : > { %345 = vadd.xlane.f32.xlu1 %v344_v30 }
 0x3c3   : > { %302 = vperm.xlu1 %588, %v540_v33   ;;  %v377_v33 = vld [vmem:[%s764_s2 + $0x8] sm:$0xff] }
 0x3c7   : > { %589 = vset.pattern.permute.xlu1 %v648_v31 }
 0x3e7   : > { %294 = vadd.xlane.f32.xlu1 %v293_v39 }
 0x43b   : > { %v346_v40 = vpop.xlane.xlu1 %345 }
 0x43c   : > { %595 = vlog2.f32 %v346_v40 }
 0x43f   : > { %v303_v42 = vpop.permute.xlu1 %302 }
 0x440   : > { %vm304_vm11 = vcmp.eq.s32.totalorder %v729_v41, %v303_v42 }
 0x441   : > { %v305_v43 = vsel %vm304_vm11, %v284_v21, 0.0 }
 0x442   : > { %v306_v44 = vsel %vm286_vm9, %v305_v43, 0.0 }
 0x443   : > { %307 = vadd.xlane.f32.xlu0 %v306_v44 }
 0x449   : > { %v596_v45 = vpop.eup %595 }
 0x44a   : > { %v348_v46 = vmul.f32 0.6931472, %v596_v45 }
 0x44c   : > { %v349_v47 = vadd.f32 %v348_v46, %v335_v24 }
 0x44e   : > { %v350_v48 = vsub.f32 %v284_v21, %v349_v47 }
 0x459   : > { %352 = vrot.lane.b32.xlu0 %v350_v48, %s645_s25 }
 0x470   : > { %v295_v49 = vpop.xlane.xlu1 %294 }
 0x471   : > { %597 = vlog2.f32 %v295_v49 }
 0x472   : > { %599 = vrcp.f32 %v419_v16 }
 0x473   : > { %601 = vrcp.f32 %v405_v17 }
 0x474   : > { %603 = vrcp.f32 %v377_v33 }
 0x47e   : > { %v598_v50 = vpop.eup %597 }
 0x47f   : > { %v297_v51 = vmul.f32 0.6931472, %v598_v50  ;;  %v600_v18 = vpop.eup %599 }
 0x480   : > { %v602_v20 = vpop.eup %601  ;;  %v421_v22 = vmul.f32 %v600_v18, %v417_v19 }
 0x481   : > { %v298_v32 = vadd.f32 %v297_v51, %v289_v35  ;;  %v441_v35 = vsub.f32 %v376_v59, %v386_v60  ;;  %v604_v37 = vpop.eup %603  ;;  %v329_v51 = vld [vmem:[#allocation2] sm:$0x1] }
 0x483   : > { %v309_v53 = vmul.f32 0.9, %v298_v32  ;;  %v442_v36 = vand.u32 2147483647, %v441_v35 }
 0x485   : > { %v443_v40 = vmul.f32 %v604_v37, %v442_v36 }
 0x487   : > { %v445_v45 = vsel %vm444_vm0, %v443_v40, 0.0 }
 0x4cc   : > { %v308_v52 = vpop.xlane.xlu0 %307 }
 0x4cd   : > { %v310_v56 = vsub.f32 %v309_v53, %v308_v52 }
 0x4cf   : > { %v312_v58 = vadd.f32 %v311_v55, %v310_v56 }
 0x4d0   : > { %v353_v54 = vpop.permute.xlu0 %352 }
 0x4d1   : > { %v355_v57 = vmul.f32 %v353_v54, %v284_v21  ;;  %v407_v21 = vmul.f32 %v602_v20, %v398_v6 }
 0x4d3   : > { %357 = vrot.lane.b32.xlu1 %v355_v57, %s646_s26  ;;  %v422_v23 = vsub.f32 %v407_v21, %v421_v22 }
 0x4d5   : > { %v423_v24 = vsub.f32 1.0, %v422_v23 }
 0x4d7   : > { %314 = vrot.lane.b32.xlu1 %v312_v58, %s647_s27  ;;  %v425_v25 = vrot.slane %v423_v24, 2 }
 0x4d9   : > { %v428_v28 = vsel %vm427_vm14, %v425_v25, 0.0 }
 0x545   : > { %v358_v26 = vpop.permute.xlu1 %357 }
 0x546   : > { %v360_v27 = vsel %vm343_vm10, %v358_v26, 0.0 }
 0x547   : > { %361 = vadd.xlane.f32.xlu0 %v360_v27 }
 0x549   : > { %v315_v29 = vpop.permute.xlu1 %314 }
 0x54a   : > { %v318_v30 = vsel %vm317_vm15, %v315_v29, 0.0 }
 0x54b   : > { %319 = vadd.xlane.f32.xlu1 %v318_v30  ;;  %429 = vadd.xlane.f32.xlu0 %v428_v28 }
 0x5d0   : > { %v362_v38 = vpop.xlane.xlu0 %361 }
 0x5d1   : > { %v363_v39 = vsub.f32 0.0, %v362_v38 }
 0x5d3   : > { %v364_v42 = vsel %vm317_vm15, %v363_v39, 0.0 }
 0x5d4   : > { %365 = vadd.xlane.f32.xlu0 %v364_v42  ;;  %v320_v43 = vpop.xlane.xlu1 %319  ;;  %v430_v54 = vpop.xlane.xlu0 %429 }
 0x5d5   : > { %v321_v44 = vrot.slane %v320_v43, 4  ;;  %v431_v55 = vrot.slane %v430_v54, 4 }
 0x5d7   : > { %v322_v46 = vadd.f32 %v321_v44, %v320_v43  ;;  %v432_v56 = vadd.f32 %v431_v55, %v430_v54 }
 0x5d8   : > { %446 = vadd.xlane.f32.xlu0 %v445_v45 }
 0x5d9   : > { %v323_v47 = vrot.slane %v322_v46, 2  ;;  %v433_v57 = vrot.slane %v432_v56, 2 }
 0x5db   : > { %v324_v48 = vadd.f32 %v323_v47, %v322_v46  ;;  %v434_v62 = vadd.f32 %v433_v57, %v432_v56 }
 0x5dd   : > { %v325_v49 = vrot.slane %v324_v48, 1  ;;  %v435_v3 = vrot.slane %v434_v62, 1 }
 0x5df   : > { %v326_v50 = vadd.f32 %v325_v49, %v324_v48  ;;  %v436_v9 = vadd.f32 %v435_v3, %v434_v62 }
 0x5e1   : > { %541 = vpush %v326_v50 }
 0x612   : > { %s542_s5 = spop %541 }
 0x613   : > { %v328_v32 = vstv %s542_s5 }
 0x614   : > { %v330_v52 = vadd.f32 %v329_v51, %v328_v32 }
 0x616   : > { %v331_v53 = vmul.f32 0.07462686, %v330_v52 }
 0x618   : > { %460 = vperm.xlu1 %589, %v331_v53  }
 0x65d   : > { %v366_v58 = vpop.xlane.xlu0 %365 }
 0x65e   : > { %v367_v59 = vrot.slane %v366_v58, 4 }
 0x660   : > { %v368_v60 = vadd.f32 %v367_v59, %v366_v58 }
 0x661   : > { %v447_v61 = vpop.xlane.xlu0 %446 }
 0x662   : > { %v369_v63 = vrot.slane %v368_v60, 2  ;;  %v448_v0 = vrot.slane %v447_v61, 4 }
 0x664   : > { %v449_v1 = vadd.f32 %v448_v0, %v447_v61  ;;  %v370_v4 = vadd.f32 %v369_v63, %v368_v60 }
 0x666   : > { %v450_v5 = vrot.slane %v449_v1, 2  ;;  %v371_v7 = vrot.slane %v370_v4, 1 }
 0x668   : > { %v451_v2 = vadd.f32 %v450_v5, %v449_v1  ;;  %v372_v8 = vadd.f32 %v371_v7, %v370_v4 }
 0x66a   : > { %543 = vpush %v372_v8  ;;  %v452_v10 = vrot.slane %v451_v2, 1 }
 0x66b   : > { %545 = vpush %v436_v9 }
 0x66c   : > { %v453_v11 = vadd.f32 %v452_v10, %v451_v2 }
 0x66e   : > { %547 = vpush %v453_v11 }
 0x693   : > { %v461_v6 = vpop.permute.xlu1 %460 }
 0x694   : > { %v466_v13 = vrot.slane %v461_v6, %v465_v12 }
 0x696   : > { %v467_v18 = vsel %vm457_vm1, %v466_v13, 0.0 }
 0x69b   : > { %s544_s6 = spop %543 }
 0x69c   : > { %v374_v14 = vstv %s544_s6  ;;  %s546_s7 = spop %545 }
 0x69d   : > { %v375_v15 = vmul.f32 0.16666667, %v374_v14  ;;  %v438_v16 = vstv %s546_s7 }
 0x69e   : > { %v439_v17 = vmul.f32 0.16666667, %v438_v16 }
 0x69f   : > { %v469_v19 = vsel %vm468_vm2, %v375_v15, 0.0  ;;  %s548_s8 = spop %547 }
 0x6a0   : > { %v470_v20 = vadd.f32 %v469_v19, %v467_v18  ;;  %v455_v21 = vstv %s548_s8  ;;  %v472_v34 = vsel %vm471_vm3, %v439_v17, 0.0 }
 0x6a1   : > { %v456_v22 = vmul.f32 0.16666667, %v455_v21 }
 0x6a2   : > { %v473_v23 = vadd.f32 %v472_v34, %v470_v20 }
 0x6a3   : > { %v475_v24 = vsel %vm474_vm4, %v456_v22, 0.0 }
 0x6a4   : > { %v476_v25 = vadd.f32 %v475_v24, %v473_v23 }
 0x6a6   : > { %477 = vst [vmem:[#allocation3] sm:$0x1] %v476_v25 }
 0x6a7 PF: > { %p553_p6 = scmp.eq.s32.totalorder %s676_s13, 2  ;;  %s649_s9 = smov [#allocation3]  }
 0x6a8   : > { %s485_s10 = sshll.u32 %s649_s9, 4  ;;  %s486_s10 = int_to_ptr.vmem [resolvable:$true] %s485_s10 }
 0x6a9   : > { %s605_s11 = scalar_lea.vmem %s486_s10, 16  ;;  %s611_s14 = scalar_lea.vmem %s486_s10, 32 }
 0x6aa   : > { %p606_p7 = scmp.ne.s32.totalorder %s486_s10, %s605_s11  ;;  %p612_p10 = scmp.lt.s32.totalorder %s486_s10, %s486_s10 }
 0x6ab   : > { %p613_p11 = scmp.lt.s32.totalorder %s611_s14, %s605_s11 }
 0x6ac   : > { %p607_p8 = pnand %p606_p7, %p553_p6 }
 0x6ad   : > { %p614_p12 = por %p613_p11, %p612_p10 }
 0x6ae   : > { %p608_p9 = pneg %p607_p8 }
 0x6b0   : > { %p615_p13 = pnand %p614_p12, %p608_p9 }
 0x6b2   : > { %618 = shalt.err (!%p615_p13)
}
 0x6b3   : > { %550 = dma.vmem_to_hbm [thread:$0]  (%p553_p6), %s486_s10, 16, %s765_s3, [#allocation4]  }
 0x6b4   : > { %634 = dma.done.wait (%p553_p6), [#allocation4], 16  }
 0x6b5   : > { %636 = vsyncadd (%p553_p6), [#allocation4], 4294967280 }
 0x6b6 PF: > { %s14_s12 = sadd.s32 1, %s639_s12  }
 0x6b7   : > { %p11_p0 = scmp.ge.s32.totalorder %s14_s12, 5  }
 0x6b9   :  { %13 = sbr.rel (!%p11_p0) target bundleno = 1 (0x1), region = 67 }
 0x6be   :  { %498 = vsyncpa [#allocation4], 1 }
 0x6bf   :  { %500 = vsyncpa [#allocation4 + $0x1], 1 }

</bundles_post_ra>
